<compile_context>
chip_gen: v5e
topology: v5e:2x2
jax: 0.10.0
libtpu: 0.0.40
codegen_flags: <defaults>
</compile_context>

<pallas_src>
import functools

import numpy as np
import jax
import jax.numpy as jnp
from jax.experimental import pallas as pl
from jax.experimental.pallas import tpu as pltpu


def _round_up(x, m):
    return (x + m - 1) // m * m


def _mlp_kernel(x_ref, w1_ref, b1_ref, w2_ref, b2_ref, w3_ref, b3_ref, o_ref):
    # All math in f32 (PyTorch nn.Linear parity). Kernel is bandwidth-bound, so
    # f32 matmuls cost nothing extra on wall clock.
    x = x_ref[...].astype(jnp.float32)
    h1 = jnp.dot(x, w1_ref[...], preferred_element_type=jnp.float32) + b1_ref[...]
    h1 = jnp.maximum(h1, 0.0)
    h2 = jnp.dot(h1, w2_ref[...], preferred_element_type=jnp.float32) + b2_ref[...]
    h2 = jnp.maximum(h2, 0.0)
    out = jnp.dot(h2, w3_ref[...], preferred_element_type=jnp.float32) + b3_ref[...]
    o_ref[...] = out.astype(o_ref.dtype)  # Identity output activation


@functools.partial(jax.jit, static_argnames=("block_b",))
def mlp_forward(x, w1, b1, w2, b2, w3, b3, *, block_b=1024):
    out_dtype = x.dtype
    B, D_in = x.shape
    H1 = w1.shape[1]
    H2 = w2.shape[1]
    D_out = w3.shape[1]

    # ---- batch tile ----------------------------------------------------------
    # Small batches: just round up to a sublane multiple (single grid step).
    # Large batches: tile of up to block_b rows, multiple of 256, and capped at
    # ceil(B/2) so the grid has >= 2 steps (keeps both v7x TensorCores busy).
    if B <= 512:
        bb = max(8, _round_up(min(B, block_b), 8))
    else:
        bb = min(int(block_b), _round_up(-(-B // 2), 256))
        bb = max(256, bb)
    B_p = _round_up(B, bb)

    # Only pad the batch when it doesn't divide evenly (no dtype-cast pass over x).
    x_in = x if B_p == B else jnp.pad(x, ((0, B_p - B), (0, 0)))

    w1f = w1.astype(jnp.float32)
    w2f = w2.astype(jnp.float32)
    w3f = w3.astype(jnp.float32)
    b1f = b1.astype(jnp.float32).reshape(1, H1)
    b2f = b2.astype(jnp.float32).reshape(1, H2)
    b3f = b3.astype(jnp.float32).reshape(1, D_out)

    # ---- VMEM budget (tight, computed from working set) ----------------------
    itemsize = 4
    weight_elems = D_in * H1 + H1 * H2 + H2 * D_out + H1 + H2 + D_out
    working_set = itemsize * (
        2 * bb * (D_in + D_out)        # double-buffered x / out tiles
        + 2 * weight_elems             # resident weights (with margin)
        + bb * (H1 + H2)               # h1 / h2 intermediates
    )
    vmem_limit = int(min(max(2 * working_set, 16 * 1024 * 1024), 96 * 1024 * 1024))

    # ---- cost estimate (helps XLA schedule around this mem-bound call) -------
    flops = 2 * B_p * (D_in * H1 + H1 * H2 + H2 * D_out)
    bytes_accessed = (
        B_p * D_in * x_in.dtype.itemsize
        + weight_elems * itemsize
        + B_p * D_out * jnp.dtype(out_dtype).itemsize
    )

    resident = pl.Buffered(1)  # constant index map -> keep single-buffered in VMEM
    in_specs = [
        pl.BlockSpec((bb, D_in), lambda i: (i, 0)),                            # x tile
        pl.BlockSpec((D_in, H1), lambda i: (0, 0), pipeline_mode=resident),    # W1
        pl.BlockSpec((1, H1), lambda i: (0, 0), pipeline_mode=resident),       # b1
        pl.BlockSpec((H1, H2), lambda i: (0, 0), pipeline_mode=resident),      # W2
        pl.BlockSpec((1, H2), lambda i: (0, 0), pipeline_mode=resident),       # b2
        pl.BlockSpec((H2, D_out), lambda i: (0, 0), pipeline_mode=resident),   # W3
        pl.BlockSpec((1, D_out), lambda i: (0, 0), pipeline_mode=resident),    # b3
    ]
    # D_out equals the full array dim -> (8,128) rule satisfied; un-padded stores.
    out_specs = pl.BlockSpec((bb, D_out), lambda i: (i, 0))

    out = pl.pallas_call(
        _mlp_kernel,
        out_shape=jax.ShapeDtypeStruct((B_p, D_out), out_dtype),
        grid_spec=pltpu.PrefetchScalarGridSpec(
            num_scalar_prefetch=0,
            grid=(B_p // bb,),
            in_specs=in_specs,
            out_specs=out_specs,
        ),
        compiler_params=pltpu.CompilerParams(
            dimension_semantics=("parallel",),
            vmem_limit_bytes=vmem_limit,
        ),
        cost_estimate=pl.CostEstimate(
            flops=flops, transcendentals=0, bytes_accessed=bytes_accessed),
    )(x_in, w1f, b1f, w2f, b2f, w3f, b3f)

    return out if B_p == B else out[:B]


# ----------------------------- init & references --------------------------------

def _orthogonal(key, shape, gain=1.0):
    """Deterministic orthogonal init (mimics utils.orthogonal_init); QR on host."""
    rows, cols = shape
    n = max(rows, cols)
    a = np.asarray(jax.random.normal(key, (n, n), dtype=jnp.float32))
    q, r = np.linalg.qr(a)
    q = q * np.sign(np.diag(r))
    return jnp.asarray(gain * q[:rows, :cols], dtype=jnp.float32)


def make_mlp_params(key, input_dim, output_dim, hidden_dims=(256, 256)):
    k1, k2, k3 = jax.random.split(key, 3)
    w1 = _orthogonal(k1, (input_dim, hidden_dims[0]))
    b1 = jnp.zeros((1, hidden_dims[0]), jnp.float32)
    w2 = _orthogonal(k2, (hidden_dims[0], hidden_dims[1]))
    b2 = jnp.zeros((1, hidden_dims[1]), jnp.float32)
    w3 = _orthogonal(k3, (hidden_dims[1], output_dim))
    b3 = jnp.zeros((1, output_dim), jnp.float32)
    return w1, b1, w2, b2, w3, b3


def mlp_reference_f32(x, w1, b1, w2, b2, w3, b3):
    h1 = jnp.maximum(x @ w1 + b1, 0.0)
    h2 = jnp.maximum(h1 @ w2 + b2, 0.0)
    return h2 @ w3 + b3


if __name__ == "__main__":
    key = jax.random.PRNGKey(0)
    kx, kp = jax.random.split(key)

    B, input_dim, output_dim = 8, 32, 16
    x = jax.random.normal(kx, (B, input_dim), dtype=jnp.float32)
    params = make_mlp_params(kp, input_dim, output_dim, hidden_dims=(256, 256))

    out = mlp_forward(x, *params)
    out = jax.block_until_ready(out)

    ref = mlp_reference_f32(x, *params)

    assert out.shape == (B, output_dim)
    assert jnp.allclose(out, ref, atol=2e-2, rtol=2e-2), "mismatch vs f32 reference"

    print("KERNEL_OK")
</pallas_src>

<mosaic_0001>
module attributes {stable_mosaic.version = 11 : i64} {
  func.func @_mlp_kernel(%arg0: i32, %arg1: memref<8x32xf32, #tpu.memory_space<vmem>>, %arg2: memref<32x256xf32, #tpu.memory_space<vmem>>, %arg3: memref<1x256xf32, #tpu.memory_space<vmem>>, %arg4: memref<256x256xf32, #tpu.memory_space<vmem>>, %arg5: memref<1x256xf32, #tpu.memory_space<vmem>>, %arg6: memref<256x16xf32, #tpu.memory_space<vmem>>, %arg7: memref<1x16xf32, #tpu.memory_space<vmem>>, %arg8: memref<8x16xf32, #tpu.memory_space<vmem>>) attributes {dimension_semantics = [#tpu.dimension_semantics<parallel>], iteration_bounds = array<i64: 1>, scalar_prefetch = 0 : i64, scratch_operands = 0 : i64, tpu.core_type = #tpu.core_type<tc>, window_params = [{transform_indices = @transform_0, window_bounds = array<i64: 8, 32>}, {pipeline_mode = #tpu.pipeline_mode<synchronous>, transform_indices = @transform_1, window_bounds = array<i64: 32, 256>}, {pipeline_mode = #tpu.pipeline_mode<synchronous>, transform_indices = @transform_2, window_bounds = array<i64: 1, 256>}, {pipeline_mode = #tpu.pipeline_mode<synchronous>, transform_indices = @transform_3, window_bounds = array<i64: 256, 256>}, {pipeline_mode = #tpu.pipeline_mode<synchronous>, transform_indices = @transform_4, window_bounds = array<i64: 1, 256>}, {pipeline_mode = #tpu.pipeline_mode<synchronous>, transform_indices = @transform_5, window_bounds = array<i64: 256, 16>}, {pipeline_mode = #tpu.pipeline_mode<synchronous>, transform_indices = @transform_6, window_bounds = array<i64: 1, 16>}, {transform_indices = @transform_7, window_bounds = array<i64: 8, 16>}]} {
    %c0 = arith.constant 0 : index
    %c0_0 = arith.constant 0 : index
    %0 = vector.load %arg1[%c0, %c0_0] : memref<8x32xf32, #tpu.memory_space<vmem>>, vector<8x32xf32>
    %c0_1 = arith.constant 0 : index
    %c0_2 = arith.constant 0 : index
    %1 = vector.load %arg2[%c0_1, %c0_2] : memref<32x256xf32, #tpu.memory_space<vmem>>, vector<32x256xf32>
    %cst = arith.constant dense<0.000000e+00> : vector<8x256xf32>
    %2 = tpu.matmul %0, %1, %cst {dimension_numbers = #tpu.dot_dimension_numbers<[1], [0], [0], [1], [0, 0, 1, 1], [], []>} : vector<8x32xf32>, vector<32x256xf32>, vector<8x256xf32> -> vector<8x256xf32>
    %c0_3 = arith.constant 0 : index
    %c0_4 = arith.constant 0 : index
    %3 = vector.load %arg3[%c0_3, %c0_4] : memref<1x256xf32, #tpu.memory_space<vmem>>, vector<1x256xf32>
    %4 = vector.broadcast %3 : vector<1x256xf32> to vector<8x256xf32>
    %5 = arith.addf %2, %4 : vector<8x256xf32>
    %cst_5 = arith.constant 0.000000e+00 : f32
    %6 = vector.broadcast %cst_5 : f32 to vector<8x256xf32>
    %7 = arith.maximumf %5, %6 : vector<8x256xf32>
    %c0_6 = arith.constant 0 : index
    %c0_7 = arith.constant 0 : index
    %8 = vector.load %arg4[%c0_6, %c0_7] : memref<256x256xf32, #tpu.memory_space<vmem>>, vector<256x256xf32>
    %cst_8 = arith.constant dense<0.000000e+00> : vector<8x256xf32>
    %9 = tpu.matmul %7, %8, %cst_8 {dimension_numbers = #tpu.dot_dimension_numbers<[1], [0], [0], [1], [0, 0, 1, 1], [], []>} : vector<8x256xf32>, vector<256x256xf32>, vector<8x256xf32> -> vector<8x256xf32>
    %c0_9 = arith.constant 0 : index
    %c0_10 = arith.constant 0 : index
    %10 = vector.load %arg5[%c0_9, %c0_10] : memref<1x256xf32, #tpu.memory_space<vmem>>, vector<1x256xf32>
    %11 = vector.broadcast %10 : vector<1x256xf32> to vector<8x256xf32>
    %12 = arith.addf %9, %11 : vector<8x256xf32>
    %cst_11 = arith.constant 0.000000e+00 : f32
    %13 = vector.broadcast %cst_11 : f32 to vector<8x256xf32>
    %14 = arith.maximumf %12, %13 : vector<8x256xf32>
    %c0_12 = arith.constant 0 : index
    %c0_13 = arith.constant 0 : index
    %15 = vector.load %arg6[%c0_12, %c0_13] : memref<256x16xf32, #tpu.memory_space<vmem>>, vector<256x16xf32>
    %cst_14 = arith.constant dense<0.000000e+00> : vector<8x16xf32>
    %16 = tpu.matmul %14, %15, %cst_14 {dimension_numbers = #tpu.dot_dimension_numbers<[1], [0], [0], [1], [0, 0, 1, 1], [], []>} : vector<8x256xf32>, vector<256x16xf32>, vector<8x16xf32> -> vector<8x16xf32>
    %c0_15 = arith.constant 0 : index
    %c0_16 = arith.constant 0 : index
    %17 = vector.load %arg7[%c0_15, %c0_16] : memref<1x16xf32, #tpu.memory_space<vmem>>, vector<1x16xf32>
    %18 = vector.broadcast %17 : vector<1x16xf32> to vector<8x16xf32>
    %19 = arith.addf %16, %18 : vector<8x16xf32>
    %c0_17 = arith.constant 0 : index
    %c0_18 = arith.constant 0 : index
    %20 = vector.load %arg8[%c0_17, %c0_18] : memref<8x16xf32, #tpu.memory_space<vmem>>, vector<8x16xf32>
    tpu.vector_store %arg8[%c0_17, %c0_18], %19 {strides = array<i32>} : memref<8x16xf32, #tpu.memory_space<vmem>>, vector<8x16xf32>,
    return
  }
  func.func @transform_0(%arg0: i32) -> (i32, i32) {
    %c0_i32 = arith.constant 0 : i32
    %c0_i32_0 = arith.constant 0 : i32
    return %arg0, %c0_i32 : i32, i32
  }
  func.func @transform_1(%arg0: i32) -> (i32, i32) {
    %c0_i32 = arith.constant 0 : i32
    %c0_i32_0 = arith.constant 0 : i32
    %c0_i32_1 = arith.constant 0 : i32
    return %c0_i32, %c0_i32_0 : i32, i32
  }
  func.func @transform_2(%arg0: i32) -> (i32, i32) {
    %c0_i32 = arith.constant 0 : i32
    %c0_i32_0 = arith.constant 0 : i32
    %c0_i32_1 = arith.constant 0 : i32
    return %c0_i32, %c0_i32_0 : i32, i32
  }
  func.func @transform_3(%arg0: i32) -> (i32, i32) {
    %c0_i32 = arith.constant 0 : i32
    %c0_i32_0 = arith.constant 0 : i32
    %c0_i32_1 = arith.constant 0 : i32
    return %c0_i32, %c0_i32_0 : i32, i32
  }
  func.func @transform_4(%arg0: i32) -> (i32, i32) {
    %c0_i32 = arith.constant 0 : i32
    %c0_i32_0 = arith.constant 0 : i32
    %c0_i32_1 = arith.constant 0 : i32
    return %c0_i32, %c0_i32_0 : i32, i32
  }
  func.func @transform_5(%arg0: i32) -> (i32, i32) {
    %c0_i32 = arith.constant 0 : i32
    %c0_i32_0 = arith.constant 0 : i32
    %c0_i32_1 = arith.constant 0 : i32
    return %c0_i32, %c0_i32_0 : i32, i32
  }
  func.func @transform_6(%arg0: i32) -> (i32, i32) {
    %c0_i32 = arith.constant 0 : i32
    %c0_i32_0 = arith.constant 0 : i32
    %c0_i32_1 = arith.constant 0 : i32
    return %c0_i32, %c0_i32_0 : i32, i32
  }
  func.func @transform_7(%arg0: i32) -> (i32, i32) {
    %c0_i32 = arith.constant 0 : i32
    %c0_i32_0 = arith.constant 0 : i32
    return %arg0, %c0_i32 : i32, i32
  }
}

</mosaic_0001>

<bundles_post_ra>
// kernel: mlp_forward.1
= control target key start
LH: loop header
LB: loop body
LE: loop exit
PB: predicated region body
PF: predicated region fallthrough
CT: control target
= control target key end

     0   :  { %12 = vsyncpa [#allocation3], 0  ;;  %s592_s0 = inlined_call_operand.vmem [shape: f32[8,32], index: 0, kind: input, shape index: {}]   ;;  %s593_s1 = inlined_call_operand.vmem [shape: f32[32,256], index: 1, kind: input, shape index: {}]   ;;  %s594_s2 = inlined_call_operand.vmem [shape: f32[1,256], index: 2, kind: input, shape index: {}]   ;;  %s595_s3 = inlined_call_operand.hbm [shape: f32[256,256], index: 3, kind: input, shape index: {}]   ;;  %s596_s4 = inlined_call_operand.vmem [shape: f32[1,256], index: 4, kind: input, shape index: {}]   ;;  %s597_s5 = inlined_call_operand.vmem [shape: f32[256,16], index: 5, kind: input, shape index: {}]   ;;  %s598_s6 = inlined_call_operand.vmem [shape: f32[1,16], index: 6, kind: input, shape index: {}]   ;;  %s599_s7 = inlined_call_operand.hbm [shape: f32[8,16], index: 7, kind: output, shape index: {}]  }
   0x1   :  { %13 = vsyncpa [#allocation4], 0  ;;  %s24_s26 = sshll.u32 %s595_s3, 4  ;;  %s410_s27 = smov [#allocation2]   ;;  %s25_s26 = int_to_ptr.hbm [resolvable:$true] %s24_s26 }
   0x2   :  { %s26_s28 = sshll.u32 %s410_s27, 4  ;;  %s411_s29 = smov 256   ;;  %s27_s28 = int_to_ptr.vmem [resolvable:$true] %s26_s28 }
   0x3   :  { %s412_s30 = smov 16  }
   0x4   :  { %32 = dma.hbm_to_vmem [thread:$0]  %s25_s26, 8192, %s27_s28, [#allocation3], %s411_s29, %s411_s29, %s412_s30  }
   0x5   :  { %406 = dma.done.wait [#allocation3], 8192  }
   0x6   :  { %407 = vsyncadd [#allocation3], 4294959104  ;;  %v50_v0 = vld [vmem:[%s593_s1 + $0x30] sm:$0xff]  ;;  %v48_v1 = vld [vmem:[%s593_s1 + $0x20] sm:$0xff]  ;;  %vm58_vm0 = vcmask 261120   ;;  %vm332_vm1 = vcmask 130048  }
   0x7   :  { %v51_v2 = vld [vmem:[%s593_s1 + $0x38] sm:$0xff]  ;;  %74 = vmatpush.msra.mxu0 %v50_v0  ;;  %v49_v3 = vld [vmem:[%s593_s1 + $0x28] sm:$0xff]  ;;  %v46_v4 = vld [vmem:[%s593_s1 + $0x10] sm:$0xff] }
   0x8   :  { %94 = vmatpush.msra.mxu1 %v51_v2  ;;  %v47_v5 = vld [vmem:[%s593_s1 + $0x18] sm:$0xff]  ;;  %v134_v6 = vld [vmem:[#allocation2 + $0xf0] sm:$0xff]  ;;  %v132_v7 = vld [vmem:[#allocation2 + $0xe0] sm:$0xff] }
   0x9   :  { %75 = vmatpush.msra.mxu0 %v48_v1  ;;  %v44_v8 = vld [vmem:[%s593_s1] sm:$0xff]  ;;  %v45_v9 = vld [vmem:[%s593_s1 + $0x8] sm:$0xff]  ;;  %174 = vmatpush.msra.mxu2 %v134_v6  ;;  %v166_v10 = vld [vmem:[#allocation2 + $0x1f0] sm:$0xff] }
   0xa   :  { %95 = vmatpush.msra.mxu1 %v49_v3  ;;  %v43_v11 = vld [vmem:[%s592_s0] sm:$0xff]  ;;  %v135_v12 = vld [vmem:[#allocation2 + $0xf8] sm:$0xff]  ;;  %194 = vmatpush.msra.mxu3 %v166_v10  ;;  %v130_v14 = vld [vmem:[#allocation2 + $0xd0] sm:$0xff] }
   0xb   :  { %76 = vmatpush.msra.mxu0 %v46_v4  ;;  %175 = vmatpush.msra.mxu2 %v132_v7  ;;  %v167_v13 = vld [vmem:[#allocation2 + $0x1f8] sm:$0xff]  ;;  %v164_v15 = vld [vmem:[#allocation2 + $0x1e0] sm:$0xff]  ;;  %v133_v16 = vld [vmem:[#allocation2 + $0xe8] sm:$0xff] }
   0xc   :  { %96 = vmatpush.msra.mxu1 %v47_v5  ;;  %v165_v17 = vld [vmem:[#allocation2 + $0x1e8] sm:$0xff]  ;;  %v128_v18 = vld [vmem:[#allocation2 + $0xc0] sm:$0xff]  ;;  %v162_v19 = vld [vmem:[#allocation2 + $0x1d0] sm:$0xff]  ;;  %195 = vmatpush.msra.mxu3 %v164_v15 }
   0xd   :  { %77 = vmatpush.msra.mxu0 %v44_v8  ;;  %176 = vmatpush.msra.mxu2 %v130_v14  ;;  %v131_v20 = vld [vmem:[#allocation2 + $0xd8] sm:$0xff]  ;;  %v126_v22 = vld [vmem:[#allocation2 + $0xb0] sm:$0xff]  ;;  %v160_v23 = vld [vmem:[#allocation2 + $0x1c0] sm:$0xff] }
   0xe   :  { %97 = vmatpush.msra.mxu1 %v45_v9  ;;  %351 = vmatmul.msk.f32.vlgmr.msra.gmra.mxu0 %vm58_vm0, %v43_v11  ;;  %v163_v21 = vld [vmem:[#allocation2 + $0x1d8] sm:$0xff]  ;;  %v129_v24 = vld [vmem:[#allocation2 + $0xc8] sm:$0xff]  ;;  %v124_v26 = vld [vmem:[#allocation2 + $0xa0] sm:$0xff] }
   0xf   :  { %352 = vmatmul.msk.f32.vlgmr.msra.gmra.mxu1 %vm58_vm0, %v43_v11  ;;  %214 = vmatpush.msrb.mxu0 %v135_v12  ;;  %v161_v25 = vld [vmem:[#allocation2 + $0x1c8] sm:$0xff]  ;;  %v158_v27 = vld [vmem:[#allocation2 + $0x1b0] sm:$0xff]  ;;  %v127_v28 = vld [vmem:[#allocation2 + $0xb8] sm:$0xff] }
  0x10   :  { %234 = vmatpush.msrb.mxu1 %v167_v13  ;;  %177 = vmatpush.msra.mxu2 %v128_v18  ;;  %v159_v29 = vld [vmem:[#allocation2 + $0x1b8] sm:$0xff]  ;;  %v122_v30 = vld [vmem:[#allocation2 + $0x90] sm:$0xff]  ;;  %v156_v31 = vld [vmem:[#allocation2 + $0x1a0] sm:$0xff] }
  0x11   :  { %215 = vmatpush.msrb.mxu0 %v133_v16  ;;  %196 = vmatpush.msra.mxu3 %v162_v19  ;;  %v125_v32 = vld [vmem:[#allocation2 + $0xa8] sm:$0xff]  ;;  %v120_v34 = vld [vmem:[#allocation2 + $0x80] sm:$0xff]  ;;  %v154_v35 = vld [vmem:[#allocation2 + $0x190] sm:$0xff] }
  0x12   :  { %235 = vmatpush.msrb.mxu1 %v165_v17  ;;  %178 = vmatpush.msra.mxu2 %v126_v22  ;;  %v157_v33 = vld [vmem:[#allocation2 + $0x1a8] sm:$0xff]  ;;  %v123_v36 = vld [vmem:[#allocation2 + $0x98] sm:$0xff]  ;;  %v118_v38 = vld [vmem:[#allocation2 + $0x70] sm:$0xff] }
  0x13   :  { %216 = vmatpush.msrb.mxu0 %v131_v20  ;;  %197 = vmatpush.msra.mxu3 %v160_v23  ;;  %v155_v37 = vld [vmem:[#allocation2 + $0x198] sm:$0xff]  ;;  %v152_v39 = vld [vmem:[#allocation2 + $0x180] sm:$0xff]  ;;  %v121_v40 = vld [vmem:[#allocation2 + $0x88] sm:$0xff] }
  0x14   :  { %236 = vmatpush.msrb.mxu1 %v163_v21  ;;  %179 = vmatpush.msra.mxu2 %v124_v26  ;;  %v153_v41 = vld [vmem:[#allocation2 + $0x188] sm:$0xff]  ;;  %v116_v42 = vld [vmem:[#allocation2 + $0x60] sm:$0xff]  ;;  %v150_v43 = vld [vmem:[#allocation2 + $0x170] sm:$0xff] }
  0x15   :  { %217 = vmatpush.msrb.mxu0 %v129_v24  ;;  %198 = vmatpush.msra.mxu3 %v158_v27  ;;  %v119_v44 = vld [vmem:[#allocation2 + $0x78] sm:$0xff]  ;;  %v114_v46 = vld [vmem:[#allocation2 + $0x50] sm:$0xff]  ;;  %v148_v47 = vld [vmem:[#allocation2 + $0x160] sm:$0xff] }
  0x16   :  { %237 = vmatpush.msrb.mxu1 %v161_v25  ;;  %180 = vmatpush.msra.mxu2 %v122_v30  ;;  %v151_v45 = vld [vmem:[#allocation2 + $0x178] sm:$0xff]  ;;  %v117_v48 = vld [vmem:[#allocation2 + $0x68] sm:$0xff]  ;;  %v112_v50 = vld [vmem:[#allocation2 + $0x40] sm:$0xff] }
  0x17   :  { %218 = vmatpush.msrb.mxu0 %v127_v28  ;;  %199 = vmatpush.msra.mxu3 %v156_v31  ;;  %v149_v49 = vld [vmem:[#allocation2 + $0x168] sm:$0xff]  ;;  %v146_v51 = vld [vmem:[#allocation2 + $0x150] sm:$0xff]  ;;  %v115_v52 = vld [vmem:[#allocation2 + $0x58] sm:$0xff] }
  0x18   :  { %238 = vmatpush.msrb.mxu1 %v159_v29  ;;  %181 = vmatpush.msra.mxu2 %v120_v34  ;;  %v147_v53 = vld [vmem:[#allocation2 + $0x158] sm:$0xff]  ;;  %v110_v54 = vld [vmem:[#allocation2 + $0x30] sm:$0xff]  ;;  %v144_v55 = vld [vmem:[#allocation2 + $0x140] sm:$0xff] }
  0x19   :  { %219 = vmatpush.msrb.mxu0 %v125_v32  ;;  %200 = vmatpush.msra.mxu3 %v154_v35  ;;  %v113_v56 = vld [vmem:[#allocation2 + $0x48] sm:$0xff]  ;;  %v111_v58 = vld [vmem:[#allocation2 + $0x38] sm:$0xff]  ;;  %v108_v59 = vld [vmem:[#allocation2 + $0x20] sm:$0xff] }
  0x1a   :  { %239 = vmatpush.msrb.mxu1 %v157_v33  ;;  %182 = vmatpush.msra.mxu2 %v118_v38  ;;  %v145_v57 = vld [vmem:[#allocation2 + $0x148] sm:$0xff]  ;;  %v142_v60 = vld [vmem:[#allocation2 + $0x130] sm:$0xff]  ;;  %v143_v62 = vld [vmem:[#allocation2 + $0x138] sm:$0xff] }
  0x1b   :  { %220 = vmatpush.msrb.mxu0 %v123_v36  ;;  %201 = vmatpush.msra.mxu3 %v152_v39  ;;  %v109_v61 = vld [vmem:[#allocation2 + $0x28] sm:$0xff]  ;;  %v106_v63 = vld [vmem:[#allocation2 + $0x10] sm:$0xff]  ;;  %v140_v0 = vld [vmem:[#allocation2 + $0x120] sm:$0xff] }
  0x1c   :  { %240 = vmatpush.msrb.mxu1 %v155_v37  ;;  %183 = vmatpush.msra.mxu2 %v116_v42  ;;  %v107_v1 = vld [vmem:[#allocation2 + $0x18] sm:$0xff]  ;;  %v141_v2 = vld [vmem:[#allocation2 + $0x128] sm:$0xff]  ;;  %v104_v3 = vld [vmem:[#allocation2] sm:$0xff] }
  0x1d   :  { %221 = vmatpush.msrb.mxu0 %v121_v40  ;;  %202 = vmatpush.msra.mxu3 %v150_v43  ;;  %v138_v4 = vld [vmem:[#allocation2 + $0x110] sm:$0xff]  ;;  %v105_v5 = vld [vmem:[#allocation2 + $0x8] sm:$0xff]  ;;  %v139_v6 = vld [vmem:[#allocation2 + $0x118] sm:$0xff] }
  0x1e   :  { %241 = vmatpush.msrb.mxu1 %v153_v41  ;;  %184 = vmatpush.msra.mxu2 %v114_v46  ;;  %v136_v7 = vld [vmem:[#allocation2 + $0x100] sm:$0xff]  ;;  %v137_v8 = vld [vmem:[#allocation2 + $0x108] sm:$0xff]  ;;  %v287_v9 = vld [vmem:[%s597_s5 + $0xf8] sm:$0xff] }
  0x1f   :  { %222 = vmatpush.msrb.mxu0 %v119_v44  ;;  %203 = vmatpush.msra.mxu3 %v148_v47  ;;  %v286_v10 = vld [vmem:[%s597_s5 + $0xf0] sm:$0xff]  ;;  %v271_v11 = vld [vmem:[%s597_s5 + $0x78] sm:$0xff]  ;;  %v285_v13 = vld [vmem:[%s597_s5 + $0xe8] sm:$0xff] }
  0x20   :  { %242 = vmatpush.msrb.mxu1 %v151_v45  ;;  %185 = vmatpush.msra.mxu2 %v112_v50  ;;  %v270_v12 = vld [vmem:[%s597_s5 + $0x70] sm:$0xff]  ;;  %v269_v14 = vld [vmem:[%s597_s5 + $0x68] sm:$0xff]  ;;  %v284_v15 = vld [vmem:[%s597_s5 + $0xe0] sm:$0xff] }
  0x21   :  { %223 = vmatpush.msrb.mxu0 %v117_v48  ;;  %204 = vmatpush.msra.mxu3 %v146_v51  ;;  %v268_v16 = vld [vmem:[%s597_s5 + $0x60] sm:$0xff]  ;;  %v283_v17 = vld [vmem:[%s597_s5 + $0xd8] sm:$0xff]  ;;  %v282_v19 = vld [vmem:[%s597_s5 + $0xd0] sm:$0xff] }
  0x22   :  { %243 = vmatpush.msrb.mxu1 %v149_v49  ;;  %186 = vmatpush.msra.mxu2 %v110_v54  ;;  %v267_v18 = vld [vmem:[%s597_s5 + $0x58] sm:$0xff]  ;;  %v266_v20 = vld [vmem:[%s597_s5 + $0x50] sm:$0xff]  ;;  %v281_v21 = vld [vmem:[%s597_s5 + $0xc8] sm:$0xff] }
  0x23   :  { %224 = vmatpush.msrb.mxu0 %v115_v52  ;;  %205 = vmatpush.msra.mxu3 %v144_v55  ;;  %v265_v22 = vld [vmem:[%s597_s5 + $0x48] sm:$0xff]  ;;  %v280_v23 = vld [vmem:[%s597_s5 + $0xc0] sm:$0xff]  ;;  %v279_v25 = vld [vmem:[%s597_s5 + $0xb8] sm:$0xff] }
  0x24   :  { %244 = vmatpush.msrb.mxu1 %v147_v53  ;;  %187 = vmatpush.msra.mxu2 %v108_v59  ;;  %v264_v24 = vld [vmem:[%s597_s5 + $0x40] sm:$0xff]  ;;  %v263_v26 = vld [vmem:[%s597_s5 + $0x38] sm:$0xff]  ;;  %v278_v27 = vld [vmem:[%s597_s5 + $0xb0] sm:$0xff] }
  0x25   :  { %225 = vmatpush.msrb.mxu0 %v113_v56  ;;  %206 = vmatpush.msra.mxu3 %v142_v60  ;;  %v277_v28 = vld [vmem:[%s597_s5 + $0xa8] sm:$0xff]  ;;  %v52_v29 = vld [vmem:[%s594_s2] sm:$0x3]  ;;  %v262_v39 = vld [vmem:[%s597_s5 + $0x30] sm:$0xff]  ;;  %s341_s2 = sshll.u32 %s599_s7, 4  ;;  %s342_s2 = int_to_ptr.hbm [resolvable:$true] %s341_s2 }
  0x26   :  { %245 = vmatpush.msrb.mxu1 %v145_v57  ;;  %188 = vmatpush.msra.mxu2 %v106_v63  ;;  %v276_v30 = vld [vmem:[%s597_s5 + $0xa0] sm:$0xff]  ;;  %v54_v31 = vperm.slane %v52_v29, 0  ;;  %v55_v32 = vperm.slane %v52_v29, 1  ;;  %v275_v40 = vld [vmem:[%s597_s5 + $0x98] sm:$0xff]  ;;  %v261_v41 = vld [vmem:[%s597_s5 + $0x28] sm:$0xff] }
  0x27   :  { %226 = vmatpush.msrb.mxu0 %v111_v58  ;;  %207 = vmatpush.msra.mxu3 %v140_v0  ;;  %v274_v42 = vld [vmem:[%s597_s5 + $0x90] sm:$0xff]  ;;  %v260_v43 = vld [vmem:[%s597_s5 + $0x20] sm:$0xff]  ;;  %v273_v44 = vld [vmem:[%s597_s5 + $0x88] sm:$0xff] }
  0x28   :  { %246 = vmatpush.msrb.mxu1 %v143_v62  ;;  %189 = vmatpush.msra.mxu2 %v104_v3  ;;  %v259_v45 = vld [vmem:[%s597_s5 + $0x18] sm:$0xff]  ;;  %v272_v46 = vld [vmem:[%s597_s5 + $0x80] sm:$0xff]  ;;  %v258_v47 = vld [vmem:[%s597_s5 + $0x10] sm:$0xff] }
  0x29   :  { %227 = vmatpush.msrb.mxu0 %v109_v61  ;;  %208 = vmatpush.msra.mxu3 %v138_v4  ;;  %v257_v48 = vld [vmem:[%s597_s5 + $0x8] sm:$0xff]  ;;  %v256_v49 = vld [vmem:[%s597_s5] sm:$0xff] }
  0x2a   :  { %247 = vmatpush.msrb.mxu1 %v141_v2  ;;  %292 = vmatpush.msrb.mxu2 %v271_v11  ;;  %v168_v50 = vld [vmem:[%s596_s4] sm:$0x3]  ;;  %s413_s4 = smov [#allocation5]  }
  0x2b   :  { %228 = vmatpush.msrb.mxu0 %v107_v1  ;;  %209 = vmatpush.msra.mxu3 %v136_v7  ;;  %v171_v51 = vperm.slane %v168_v50, 1  ;;  %v170_v56 = vperm.slane %v168_v50, 0  ;;  %v357_v63 = vld [vmem:[%s598_s6] ss:$0 sm:$0xff]  ;;  %s339_s15 = sshll.u32 %s413_s4, 4  ;;  %s340_s15 = int_to_ptr.vmem [resolvable:$true] %s339_s15 }
  0x2c   :  { %248 = vmatpush.msrb.mxu1 %v139_v6  ;;  %293 = vmatpush.msrb.mxu2 %v270_v12 }
  0x2d   :  { %229 = vmatpush.msrb.mxu0 %v105_v5  ;;  %312 = vmatpush.msrb.mxu3 %v287_v9 }
  0x2e   :  { %249 = vmatpush.msrb.mxu1 %v137_v8  ;;  %294 = vmatpush.msrb.mxu2 %v269_v14 }
  0x2f   :  { %313 = vmatpush.msrb.mxu3 %v286_v10 }
  0x30   :  { %295 = vmatpush.msrb.mxu2 %v268_v16 }
  0x31   :  { %314 = vmatpush.msrb.mxu3 %v285_v13 }
  0x32   :  { %296 = vmatpush.msrb.mxu2 %v267_v18 }
  0x33   :  { %315 = vmatpush.msrb.mxu3 %v284_v15 }
  0x34   :  { %297 = vmatpush.msrb.mxu2 %v266_v20 }
  0x35   :  { %316 = vmatpush.msrb.mxu3 %v283_v17 }
  0x36   :  { %298 = vmatpush.msrb.mxu2 %v265_v22 }
  0x37   :  { %317 = vmatpush.msrb.mxu3 %v282_v19 }
  0x38   :  { %299 = vmatpush.msrb.mxu2 %v264_v24 }
  0x39   :  { %318 = vmatpush.msrb.mxu3 %v281_v21 }
  0x3a   :  { %300 = vmatpush.msrb.mxu2 %v263_v26 }
  0x3b   :  { %319 = vmatpush.msrb.mxu3 %v280_v23 }
  0x3c   :  { %301 = vmatpush.msrb.mxu2 %v262_v39 }
  0x3d   :  { %320 = vmatpush.msrb.mxu3 %v279_v25 }
  0x3e   :  { %302 = vmatpush.msrb.mxu2 %v261_v41 }
  0x3f   :  { %321 = vmatpush.msrb.mxu3 %v278_v27 }
  0x40   :  { %303 = vmatpush.msrb.mxu2 %v260_v43 }
  0x41   :  { %322 = vmatpush.msrb.mxu3 %v277_v28 }
  0x42   :  { %304 = vmatpush.msrb.mxu2 %v259_v45 }
  0x43   :  { %323 = vmatpush.msrb.mxu3 %v276_v30 }
  0x44   :  { %305 = vmatpush.msrb.mxu2 %v258_v47 }
  0x45   :  { %324 = vmatpush.msrb.mxu3 %v275_v40 }
  0x46   :  { %306 = vmatpush.msrb.mxu2 %v257_v48 }
  0x47   :  { %325 = vmatpush.msrb.mxu3 %v274_v42 }
  0x48   :  { %307 = vmatpush.msrb.mxu2 %v256_v49 }
  0x49   :  { %326 = vmatpush.msrb.mxu3 %v273_v44 }
  0x4b   :  { %327 = vmatpush.msrb.mxu3 %v272_v46 }
  0x8b   :  { %v79_v33 = vpop.f32.mrf.mxu0 }
  0x8c   :  { %v99_v34 = vpop.f32.mrf.mxu1  ;;  %v80_v35 = vadd.f32 %v79_v33, %v54_v31 }
  0x8d   :  { %v100_v36 = vadd.f32 %v99_v34, %v55_v32 }
  0x8e   :  { %v102_v37 = vmax.f32 %v80_v35, 0.0 }
  0x8f   :  { %v103_v38 = vmax.f32 %v100_v36, 0.0 }
  0x90   :  { %190 = vmatmul.f32.vlgmr.msra.gmra.mxu2 %v102_v37  ;;  %230 = vmatmul.f32.vlgmr.msrb.gmra.mxu0 %v102_v37 }
  0x91   :  { %210 = vmatmul.f32.vlgmr.msra.gmra.mxu3 %v103_v38  ;;  %250 = vmatmul.f32.vlgmr.msrb.gmra.mxu1 %v103_v38 }
 0x10d   :  { %v231_v52 = vpop.f32.mrf.mxu0 }
 0x10e   :  { %v232_v53 = vadd.f32 %v231_v52, %v171_v51  ;;  %v251_v54 = vpop.f32.mrf.mxu1 }
 0x110   :  { %v252_v55 = vadd.f32 %v251_v54, %v232_v53 }
 0x112   :  { %v255_v57 = vmax.f32 %v252_v55, 0.0 }
 0x113   :  { %v191_v58 = vpop.f32.mrf.mxu2 }
 0x114   :  { %v192_v59 = vadd.f32 %v191_v58, %v170_v56  ;;  %328 = vmatmul.f32.vlgmr.msrb.gmra.mxu3 %v255_v57  ;;  %v211_v60 = vpop.f32.mrf.mxu3 }
 0x116   :  { %v212_v61 = vadd.f32 %v211_v60, %v192_v59 }
 0x118   :  { %v254_v62 = vmax.f32 %v212_v61, 0.0 }
 0x11a   :  { %308 = vmatmul.f32.vlgmr.msrb.gmra.mxu2 %v254_v62 }
 0x197   :  { %v329_v2 = vpop.f32.mrf.mxu3 }
 0x19d   :  { %v309_v0 = vpop.f32.mrf.mxu2 }
 0x19e   :  { %v310_v1 = vadd.f32 %v357_v63, %v309_v0 }
 0x1a0   :  { %v330_v3 = vadd.f32 %v329_v2, %v310_v1 }
 0x1a2   :  { %333 = vst.msk [vmem:[#allocation5] sm:$0xff] %vm332_vm1, %v330_v3 }
 0x1a3   :  { %344 = dma.vmem_to_hbm [thread:$0]  %s340_s15, 128, %s342_s2, [#allocation4]  }
 0x1a4   :  { %408 = dma.done.wait [#allocation4], 128  }
 0x1a5   :  { %409 = vsyncadd [#allocation4], 4294967168 }
 0x1a6   :  { %349 = vsyncpa [#allocation3], 1 }
 0x1a7   :  { %350 = vsyncpa [#allocation4], 1 }

</bundles_post_ra>
